<compile_context>
chip_gen: v7x
topology: tpu7x:2x2x1
jax: 0.10.0
libtpu: 0.0.40
codegen_flags: <defaults>
</compile_context>

<pallas_src>
import jax
import jax.numpy as jnp
from jax import lax
from jax.experimental import pallas as pl
from jax.experimental.pallas import tpu as pltpu


def _round_up(x, m):
    return ((x + m - 1) // m) * m


def _cdiv(a, b):
    return -(-a // b)


def make_decoder_kernel(cin, s1, h1p, dp, h0, z_dim, approx_recip):
    """cin/s1/h1p/dp are the padded contraction / lane widths of the packed slabs."""
    zv_lo = h0 + z_dim
    zv_hi = h0 + 2 * z_dim

    def kernel(zy_ref, p1_ref, p2_ref, p3_ref, out_ref):
        f32 = jnp.float32

        # ---- fused stage 1: [z|y] @ blockdiag(W_z1, [W_y1|W_y2]) + biases ----
        zy = zy_ref[...]
        s1v = (jnp.dot(zy, p1_ref[:cin, :], preferred_element_type=f32)
               + p1_ref[cin:cin + 1, :].astype(f32))          # (TB, s1)
        r1 = jnp.maximum(s1v, 0.0)                             # relu (layer1 | zm | -)

        # ---- z branch: layer2 + softmax output -------------------------------
        # W2 rows for the y-lanes are zero, so no lane slicing of r1 is needed.
        a1 = r1.astype(p2_ref.dtype)
        s2 = (jnp.dot(a1, p2_ref[:s1, :], preferred_element_type=f32)
              + p2_ref[s1:s1 + 1, :].astype(f32))              # (TB, h1p)
        r2 = jnp.maximum(s2, 0.0)                              # relu (+ dropout = id)
        a2 = r2.astype(p3_ref.dtype)
        logits = (jnp.dot(a2, p3_ref[:h1p, :], preferred_element_type=f32)
                  + p3_ref[h1p:h1p + 1, :].astype(f32))        # (TB, dp)
        # softmax along features (PyTorch dim=1); pad lanes carry -1e30 bias -> exp()=0
        m = jnp.max(logits, axis=-1, keepdims=True)
        e = jnp.exp(logits - m)
        inv_s = pl.reciprocal(jnp.sum(e, axis=-1, keepdims=True), approx=approx_recip)
        out_ref[:, :dp] = (e * inv_s).astype(out_ref.dtype)

        # ---- y branch: relu for zm lanes, softplus for zv lanes ---------------
        # numerically-stable softplus: max(x,0) + log1p(exp(-|x|))
        sp = r1 + jnp.log1p(jnp.exp(-jnp.abs(s1v)))
        lane = lax.broadcasted_iota(jnp.int32, s1v.shape, 1)
        act = jnp.where((lane >= zv_lo) & (lane < zv_hi), sp, r1)
        out_ref[:, dp:] = act.astype(out_ref.dtype)

    return kernel


def decoder_forward(z, y, packed, *, block_b=1024, approx_recip=True):
    """z: (B, z_dim), y: (B, K). packed: output of pack_params.
    Returns (zm, zv, x_recon_logit) as float32."""
    meta = packed["meta"]
    p1, p2, p3 = packed["p1"], packed["p2"], packed["p3"]
    dtype = p1.dtype
    z_dim, K, h0, D = meta["z_dim"], meta["K"], meta["h0"], meta["D"]
    cin, s1, h1p, dp = meta["cin"], meta["s1"], meta["h1p"], meta["dp"]

    B = z.shape[0]
    zy = jnp.concatenate([z, y], axis=1).astype(dtype)         # single fused input
    if cin > z_dim + K:
        zy = jnp.pad(zy, ((0, 0), (0, cin - (z_dim + K))))

    # Batch tiling: big tiles to amortize ~0.35us/step overhead; weights stay
    # VMEM-resident (constant index_map).  If the whole batch would be one large
    # step, split it in two so the parallel axis can shard across both TCs (v7x).
    B8 = _round_up(B, 8)
    TB = min(block_b, B8)
    if TB == B8 and B8 >= 16:
        TB = _round_up(_cdiv(B8, 2), 8)
    Bp = _round_up(B8, TB)
    if Bp != B:
        zy = jnp.pad(zy, ((0, Bp - B), (0, 0)))
    nb = Bp // TB
    out_w = dp + s1

    kernel = make_decoder_kernel(cin, s1, h1p, dp, h0, z_dim, approx_recip)

    grid_spec = pltpu.PrefetchScalarGridSpec(
        num_scalar_prefetch=0,
        grid=(nb,),
        in_specs=[
            pl.BlockSpec((TB, cin), lambda i: (i, 0)),     # streamed activations
            pl.BlockSpec(p1.shape, lambda i: (0, 0)),      # resident weight slabs
            pl.BlockSpec(p2.shape, lambda i: (0, 0)),
            pl.BlockSpec(p3.shape, lambda i: (0, 0)),
        ],
        out_specs=pl.BlockSpec((TB, out_w), lambda i: (i, 0)),  # single fused output
    )

    itemsize = jnp.dtype(dtype).itemsize
    blk_bytes = TB * cin * itemsize + TB * out_w * itemsize
    weight_bytes = (p1.size + p2.size + p3.size) * itemsize
    f32_temps = 8 * TB * out_w * 4
    est = 2 * blk_bytes + weight_bytes + f32_temps
    vmem_limit = int(min(max(2 * est + (8 << 20), 24 << 20), 40 << 20))

    out = pl.pallas_call(
        kernel,
        out_shape=jax.ShapeDtypeStruct((Bp, out_w), dtype),
        grid_spec=grid_spec,
        compiler_params=pltpu.CompilerParams(
            dimension_semantics=("parallel",),
            vmem_limit_bytes=vmem_limit),
    )(zy, p1, p2, p3)

    xrec = out[:B, :D].astype(jnp.float32)
    zm = out[:B, dp + h0: dp + h0 + z_dim].astype(jnp.float32)
    zv = out[:B, dp + h0 + z_dim: dp + h0 + 2 * z_dim].astype(jnp.float32)
    return zm, zv, xrec


def init_params(key, z_dim, mixture_components, hidden_dims, output_dim):
    """Deterministic synthetic parameters in (in, out) layout (= transposed
    nn.Linear weights); biases as (1, out)."""
    keys = jax.random.split(key, 10)

    def lin(kw, kb, fan_in, fan_out):
        bound = 1.0 / jnp.sqrt(fan_in)
        w = jax.random.uniform(kw, (fan_in, fan_out), jnp.float32, -bound, bound)
        b = jax.random.uniform(kb, (1, fan_out), jnp.float32, -bound, bound)
        return w, b

    wz1, bz1 = lin(keys[0], keys[1], z_dim, hidden_dims[0])            # hidden_z_1
    wz2, bz2 = lin(keys[2], keys[3], hidden_dims[0], hidden_dims[1])   # hidden_z_2
    wo, bo = lin(keys[4], keys[5], hidden_dims[1], output_dim)         # nn_out
    wy1, by1 = lin(keys[6], keys[7], mixture_components, z_dim)        # hidden_y_1
    wy2, by2 = lin(keys[8], keys[9], mixture_components, z_dim)        # hidden_y_2
    return dict(wz1=wz1, bz1=bz1, wz2=wz2, bz2=bz2, wo=wo, bo=bo,
                wy1=wy1, by1=by1, wy2=wy2, by2=by2)


def pack_params(p, *, param_dtype=jnp.bfloat16):
    """Pack the 5 linear layers into 3 padded slabs.

    p1: block-diagonal fusion of hidden_z_1 with [hidden_y_1 | hidden_y_2]
        -> (cin+8, s1), bias at row cin.   [z|y] @ p1 = [layer1_pre | zm_pre | zv_pre]
    p2: hidden_z_2 zero-padded to s1 rows / 128-mult cols -> (s1+8, h1p)
    p3: nn_out zero-padded, with -1e30 bias on softmax pad columns -> (h1p+8, dp)
    """
    wz1, bz1 = p["wz1"], p["bz1"]
    wz2, bz2 = p["wz2"], p["bz2"]
    wo, bo = p["wo"], p["bo"]
    wy1, by1 = p["wy1"], p["by1"]
    wy2, by2 = p["wy2"], p["by2"]

    z_dim, h0 = wz1.shape
    K = wy1.shape[0]
    h1 = wz2.shape[1]
    D = wo.shape[1]

    cin = _round_up(z_dim + K, 8)
    s1 = _round_up(h0 + 2 * z_dim, 128)
    h1p = _round_up(h1, 128)
    dp = _round_up(D, 128)

    # stage-1 block-diagonal slab
    w1 = jnp.zeros((cin, s1), jnp.float32)
    w1 = w1.at[:z_dim, :h0].set(wz1)
    w1 = w1.at[z_dim:z_dim + K, h0:h0 + z_dim].set(wy1)
    w1 = w1.at[z_dim:z_dim + K, h0 + z_dim:h0 + 2 * z_dim].set(wy2)
    b1 = jnp.zeros((8, s1), jnp.float32)
    b1 = b1.at[0, :h0].set(bz1[0])
    b1 = b1.at[0, h0:h0 + z_dim].set(by1[0])
    b1 = b1.at[0, h0 + z_dim:h0 + 2 * z_dim].set(by2[0])
    p1 = jnp.concatenate([w1, b1], axis=0)                     # (cin+8, s1)

    # stage-2 slab (z branch only; y-lane rows stay zero)
    w2 = jnp.zeros((s1, h1p), jnp.float32).at[:h0, :h1].set(wz2)
    b2 = jnp.zeros((8, h1p), jnp.float32).at[0, :h1].set(bz2[0])
    p2 = jnp.concatenate([w2, b2], axis=0)                     # (s1+8, h1p)

    # output slab; pad-column bias = -1e30 so softmax ignores pad lanes
    w3 = jnp.zeros((h1p, dp), jnp.float32).at[:h1, :D].set(wo)
    b3 = jnp.zeros((8, dp), jnp.float32).at[0, :D].set(bo[0])
    if dp > D:
        b3 = b3.at[0, D:].set(-1e30)
    p3 = jnp.concatenate([w3, b3], axis=0)                     # (h1p+8, dp)

    meta = dict(z_dim=z_dim, K=K, h0=h0, D=D, cin=cin, s1=s1, h1p=h1p, dp=dp)
    return dict(p1=p1.astype(param_dtype), p2=p2.astype(param_dtype),
                p3=p3.astype(param_dtype), meta=meta)


def decoder_reference(z, y, p):
    l1 = jax.nn.relu(z @ p["wz1"] + p["bz1"])
    l2 = jax.nn.relu(l1 @ p["wz2"] + p["bz2"])
    xrec = jax.nn.softmax(l2 @ p["wo"] + p["bo"], axis=1)
    zm = jax.nn.relu(y @ p["wy1"] + p["by1"])
    zv = jax.nn.softplus(y @ p["wy2"] + p["by2"])
    return zm, zv, xrec


if __name__ == "__main__":
    # Small shapes consistent with the module's __init__ signature.
    B = 8
    z_dim = 32
    mixture_components = 8
    hidden_dims = (64, 64)
    output_dim = 128
    dropout = 0.1  # unused (eval-mode identity)

    key = jax.random.PRNGKey(0)
    kz, ky, kp = jax.random.split(key, 3)
    z = jax.random.normal(kz, (B, z_dim), jnp.float32)
    y = jax.random.normal(ky, (B, mixture_components), jnp.float32)
    raw = init_params(kp, z_dim, mixture_components, hidden_dims, output_dim)
    zm_r, zv_r, xrec_r = decoder_reference(z, y, raw)

    # 1) Exact-semantics path: f32 params, full-precision reciprocal -> atol=1e-5.
    packed32 = pack_params(raw, param_dtype=jnp.float32)
    zm, zv, xrec = decoder_forward(z, y, packed32, approx_recip=False)
    jax.block_until_ready((zm, zv, xrec))
    assert zm.shape == zm_r.shape and zv.shape == zv_r.shape and xrec.shape == xrec_r.shape
    assert jnp.allclose(zm, zm_r, atol=1e-5), "zm mismatch (f32)"
    assert jnp.allclose(zv, zv_r, atol=1e-5), "zv mismatch (f32)"
    assert jnp.allclose(xrec, xrec_r, atol=1e-5), "x_recon mismatch (f32)"

    # 2) Fast path: bf16 weights/activations/outputs + approx EUP reciprocal.
    packed16 = pack_params(raw, param_dtype=jnp.bfloat16)
    zm16, zv16, xrec16 = decoder_forward(z, y, packed16, approx_recip=True)
    jax.block_until_ready((zm16, zv16, xrec16))
    assert jnp.allclose(zm16, zm_r, atol=5e-2, rtol=5e-2), "zm mismatch (bf16)"
    assert jnp.allclose(zv16, zv_r, atol=5e-2, rtol=5e-2), "zv mismatch (bf16)"
    assert jnp.allclose(xrec16, xrec_r, atol=5e-2, rtol=5e-2), "x_recon mismatch (bf16)"

    print("KERNEL_OK")
</pallas_src>

<mosaic_0001>
module attributes {stable_mosaic.version = 11 : i64} {
  func.func @kernel(%arg0: i32, %arg1: memref<8x40xf32, #tpu.memory_space<vmem>>, %arg2: memref<48x128xf32, #tpu.memory_space<vmem>>, %arg3: memref<136x128xf32, #tpu.memory_space<vmem>>, %arg4: memref<136x128xf32, #tpu.memory_space<vmem>>, %arg5: memref<8x256xf32, #tpu.memory_space<vmem>>) attributes {dimension_semantics = [#tpu.dimension_semantics<parallel>], iteration_bounds = array<i64: 1>, scalar_prefetch = 0 : i64, scratch_operands = 0 : i64, tpu.core_type = #tpu.core_type<tc>, window_params = [{transform_indices = @transform_0, window_bounds = array<i64: 8, 40>}, {pipeline_mode = #tpu.pipeline_mode<synchronous>, transform_indices = @transform_1, window_bounds = array<i64: 48, 128>}, {pipeline_mode = #tpu.pipeline_mode<synchronous>, transform_indices = @transform_2, window_bounds = array<i64: 136, 128>}, {pipeline_mode = #tpu.pipeline_mode<synchronous>, transform_indices = @transform_3, window_bounds = array<i64: 136, 128>}, {transform_indices = @transform_4, window_bounds = array<i64: 8, 256>}]} {
    %c0 = arith.constant 0 : index
    %c0_0 = arith.constant 0 : index
    %0 = vector.load %arg1[%c0, %c0_0] : memref<8x40xf32, #tpu.memory_space<vmem>>, vector<8x40xf32>
    %c0_1 = arith.constant 0 : index
    %c0_2 = arith.constant 0 : index
    %1 = vector.load %arg2[%c0_1, %c0_2] : memref<48x128xf32, #tpu.memory_space<vmem>>, vector<40x128xf32>
    %cst = arith.constant dense<0.000000e+00> : vector<8x128xf32>
    %2 = tpu.matmul %0, %1, %cst {dimension_numbers = #tpu.dot_dimension_numbers<[1], [0], [0], [1], [0, 0, 1, 1], [], []>} : vector<8x40xf32>, vector<40x128xf32>, vector<8x128xf32> -> vector<8x128xf32>
    %c40 = arith.constant 40 : index
    %c0_3 = arith.constant 0 : index
    %3 = vector.load %arg2[%c40, %c0_3] : memref<48x128xf32, #tpu.memory_space<vmem>>, vector<1x128xf32>
    %4 = vector.broadcast %3 : vector<1x128xf32> to vector<8x128xf32>
    %5 = arith.addf %2, %4 : vector<8x128xf32>
    %cst_4 = arith.constant 0.000000e+00 : f32
    %6 = vector.broadcast %cst_4 : f32 to vector<8x128xf32>
    %7 = arith.maximumf %5, %6 : vector<8x128xf32>
    %c0_5 = arith.constant 0 : index
    %c0_6 = arith.constant 0 : index
    %8 = vector.load %arg3[%c0_5, %c0_6] : memref<136x128xf32, #tpu.memory_space<vmem>>, vector<128x128xf32>
    %cst_7 = arith.constant dense<0.000000e+00> : vector<8x128xf32>
    %9 = tpu.matmul %7, %8, %cst_7 {dimension_numbers = #tpu.dot_dimension_numbers<[1], [0], [0], [1], [0, 0, 1, 1], [], []>} : vector<8x128xf32>, vector<128x128xf32>, vector<8x128xf32> -> vector<8x128xf32>
    %c128 = arith.constant 128 : index
    %c0_8 = arith.constant 0 : index
    %10 = vector.load %arg3[%c128, %c0_8] : memref<136x128xf32, #tpu.memory_space<vmem>>, vector<1x128xf32>
    %11 = vector.broadcast %10 : vector<1x128xf32> to vector<8x128xf32>
    %12 = arith.addf %9, %11 : vector<8x128xf32>
    %cst_9 = arith.constant 0.000000e+00 : f32
    %13 = vector.broadcast %cst_9 : f32 to vector<8x128xf32>
    %14 = arith.maximumf %12, %13 : vector<8x128xf32>
    %c0_10 = arith.constant 0 : index
    %c0_11 = arith.constant 0 : index
    %15 = vector.load %arg4[%c0_10, %c0_11] : memref<136x128xf32, #tpu.memory_space<vmem>>, vector<128x128xf32>
    %cst_12 = arith.constant dense<0.000000e+00> : vector<8x128xf32>
    %16 = tpu.matmul %14, %15, %cst_12 {dimension_numbers = #tpu.dot_dimension_numbers<[1], [0], [0], [1], [0, 0, 1, 1], [], []>} : vector<8x128xf32>, vector<128x128xf32>, vector<8x128xf32> -> vector<8x128xf32>
    %c128_13 = arith.constant 128 : index
    %c0_14 = arith.constant 0 : index
    %17 = vector.load %arg4[%c128_13, %c0_14] : memref<136x128xf32, #tpu.memory_space<vmem>>, vector<1x128xf32>
    %18 = vector.broadcast %17 : vector<1x128xf32> to vector<8x128xf32>
    %19 = arith.addf %16, %18 : vector<8x128xf32>
    %cst_15 = arith.constant dense<0xFF800000> : vector<8xf32>
    %20 = vector.multi_reduction <maximumf>, %19, %cst_15 [1] : vector<8x128xf32> to vector<8xf32>
    %21 = vector.shape_cast %20 : vector<8xf32> to vector<8x1xf32>
    %22 = vector.broadcast %21 : vector<8x1xf32> to vector<8x128xf32>
    %23 = arith.subf %19, %22 : vector<8x128xf32>
    %24 = math.exp %23 : vector<8x128xf32>
    %cst_16 = arith.constant dense<0.000000e+00> : vector<8xf32>
    %25 = vector.multi_reduction <add>, %24, %cst_16 [1] : vector<8x128xf32> to vector<8xf32>
    %26 = vector.shape_cast %25 : vector<8xf32> to vector<8x1xf32>
    %27 = tpu.reciprocal %26 : vector<8x1xf32> -> vector<8x1xf32>
    %28 = vector.broadcast %27 : vector<8x1xf32> to vector<8x128xf32>
    %29 = arith.mulf %24, %28 : vector<8x128xf32>
    %c0_17 = arith.constant 0 : index
    %c0_18 = arith.constant 0 : index
    %30 = vector.load %arg5[%c0_17, %c0_18] : memref<8x256xf32, #tpu.memory_space<vmem>>, vector<8x128xf32>
    tpu.vector_store %arg5[%c0_17, %c0_18], %29 {strides = array<i32>} : memref<8x256xf32, #tpu.memory_space<vmem>>, vector<8x128xf32>,
    %31 = math.absf %5 : vector<8x128xf32>
    %cst_19 = arith.constant 0.000000e+00 : f32
    %32 = vector.broadcast %cst_19 : f32 to vector<8x128xf32>
    %33 = arith.subf %32, %31 : vector<8x128xf32>
    %34 = math.exp %33 : vector<8x128xf32>
    %35 = math.log1p %34 : vector<8x128xf32>
    %36 = arith.addf %7, %35 : vector<8x128xf32>
    %37 = tpu.iota {dimensions = array<i32: 1>} : vector<8x128xi32>
    %c96_i32 = arith.constant 96 : i32
    %38 = vector.broadcast %c96_i32 : i32 to vector<8x128xi32>
    %39 = arith.cmpi sge, %37, %38 : vector<8x128xi32>
    %c128_i32 = arith.constant 128 : i32
    %40 = vector.broadcast %c128_i32 : i32 to vector<8x128xi32>
    %41 = arith.cmpi slt, %37, %40 : vector<8x128xi32>
    %42 = arith.andi %39, %41 : vector<8x128xi1>
    %43 = arith.select %42, %36, %7 : vector<8x128xi1>, vector<8x128xf32>
    %c0_20 = arith.constant 0 : index
    %c128_21 = arith.constant 128 : index
    %44 = vector.load %arg5[%c0_20, %c128_21] : memref<8x256xf32, #tpu.memory_space<vmem>>, vector<8x128xf32>
    tpu.vector_store %arg5[%c0_20, %c128_21], %43 {strides = array<i32>} : memref<8x256xf32, #tpu.memory_space<vmem>>, vector<8x128xf32>,
    return
  }
  func.func @transform_0(%arg0: i32) -> (i32, i32) {
    %c0_i32 = arith.constant 0 : i32
    %c0_i32_0 = arith.constant 0 : i32
    return %arg0, %c0_i32 : i32, i32
  }
  func.func @transform_1(%arg0: i32) -> (i32, i32) {
    %c0_i32 = arith.constant 0 : i32
    %c0_i32_0 = arith.constant 0 : i32
    %c0_i32_1 = arith.constant 0 : i32
    return %c0_i32, %c0_i32_0 : i32, i32
  }
  func.func @transform_2(%arg0: i32) -> (i32, i32) {
    %c0_i32 = arith.constant 0 : i32
    %c0_i32_0 = arith.constant 0 : i32
    %c0_i32_1 = arith.constant 0 : i32
    return %c0_i32, %c0_i32_0 : i32, i32
  }
  func.func @transform_3(%arg0: i32) -> (i32, i32) {
    %c0_i32 = arith.constant 0 : i32
    %c0_i32_0 = arith.constant 0 : i32
    %c0_i32_1 = arith.constant 0 : i32
    return %c0_i32, %c0_i32_0 : i32, i32
  }
  func.func @transform_4(%arg0: i32) -> (i32, i32) {
    %c0_i32 = arith.constant 0 : i32
    %c0_i32_0 = arith.constant 0 : i32
    return %arg0, %c0_i32 : i32, i32
  }
}

</mosaic_0001>

<bundles_post_ra>
// kernel: tpu_custom_call.1
= control target key start
LH: loop header
LB: loop body
LE: loop exit
PB: predicated region body
PF: predicated region fallthrough
CT: control target
= control target key end

     0   :  { %9 = vsyncpa [#allocation3], 0  ;;  %s830_s0 = inlined_call_operand.hbm [shape: f32[8,40], index: 0, kind: input, shape index: {}]   ;;  %s831_s1 = inlined_call_operand.hbm [shape: f32[48,128], index: 1, kind: input, shape index: {}]   ;;  %s832_s2 = inlined_call_operand.hbm [shape: f32[136,128], index: 2, kind: input, shape index: {}]   ;;  %s833_s3 = inlined_call_operand.hbm [shape: f32[136,128], index: 3, kind: input, shape index: {}]   ;;  %s834_s4 = inlined_call_operand.hbm [shape: f32[8,256], index: 4, kind: output, shape index: {}]  }
   0x1   :  { %10 = vsyncpa [#allocation6], 0 }
   0x2   :  { %11 = vsyncpa [#allocation9], 0 }
   0x3   :  { %12 = vsyncpa [#allocation4], 0  ;;  %s705_s15 = smov [#allocation5]   ;;  %s587_s19 = scalar_lea.hbm %s831_s1, 768 }
   0x4   :  { %s28_s16 = sshll.u32 %s705_s15, 4  ;;  %p588_p0 = scmp.ne.s32.totalorder %s831_s1, %s587_s19  ;;  %s29_s16 = int_to_ptr.vmem [resolvable:$true] %s28_s16 }
   0x5   :  { %p591_p1 = scmp.lt.u32.totalorder %s587_s19, %s831_s1 }
   0x7   :  { %p593_p2 = pnand %p591_p1, %p588_p0 }
   0x9   :  { %596 = shalt.err (!%p593_p2)
}
   0xa   :  { %s597_s24 = scalar_lea.vmem %s29_s16, 768  ;;  %p602_p4 = scmp.lt.s32.totalorder %s29_s16, %s29_s16 }
   0xb   :  { %p598_p3 = scmp.ne.s32.totalorder %s29_s16, %s597_s24  ;;  %p603_p5 = scmp.lt.s32.totalorder %s597_s24, %s597_s24 }
   0xd   :  { %p604_p6 = por %p603_p5, %p602_p4 }
   0xf   :  { %p605_p7 = pnand %p604_p6, %p598_p3 }
  0x11   :  { %608 = shalt.err (!%p605_p7)
}
  0x12   :  { %s706_s25 = smov 128   ;;  %s707_s26 = smov 8  }
  0x13   :  { %34 = dma.hbm_to_vmem [thread:$0]  %s831_s1, 768, %s29_s16, [#allocation6], %s706_s25, %s706_s25, %s707_s26  }
  0x14   :  { %s708_s29 = smov [#allocation2]   ;;  %s709_s5 = smov [#allocation7]  }
  0x15   :  { %s19_s30 = sshll.u32 %s708_s29, 4  ;;  %s40_s6 = sshll.u32 %s709_s5, 4  ;;  %s20_s30 = int_to_ptr.vmem [resolvable:$true] %s19_s30  ;;  %s41_s6 = int_to_ptr.vmem [resolvable:$true] %s40_s6 }
  0x16   :  { %s609_s9 = scalar_lea.hbm %s830_s0, 128 }
  0x17   :  { %p610_p8 = scmp.ne.s32.totalorder %s830_s0, %s609_s9  ;;  %p613_p9 = scmp.lt.u32.totalorder %s609_s9, %s830_s0 }
  0x19   :  { %p615_p10 = pnand %p613_p9, %p610_p8 }
  0x1b   :  { %618 = shalt.err (!%p615_p10)
}
  0x1c   :  { %s619_s1 = scalar_lea.vmem %s20_s30, 128  ;;  %p624_p12 = scmp.lt.s32.totalorder %s20_s30, %s20_s30 }
  0x1d   :  { %p620_p11 = scmp.ne.s32.totalorder %s20_s30, %s619_s1  ;;  %p625_p13 = scmp.lt.s32.totalorder %s619_s1, %s619_s1 }
  0x1f   :  { %p626_p0 = por %p625_p13, %p624_p12 }
  0x21   :  { %p627_p1 = pnand %p626_p0, %p620_p11 }
  0x23   :  { %630 = shalt.err (!%p627_p1)
}
  0x24   :  { %22 = dma.hbm_to_vmem [thread:$0]  %s830_s0, 128, %s20_s30, [#allocation3]  }
  0x25   :  { %s631_s18 = scalar_lea.hbm %s832_s2, 2176 }
  0x26   :  { %p632_p2 = scmp.ne.s32.totalorder %s832_s2, %s631_s18  ;;  %p635_p3 = scmp.lt.u32.totalorder %s631_s18, %s832_s2 }
  0x28   :  { %p637_p4 = pnand %p635_p3, %p632_p2 }
  0x2a   :  { %640 = shalt.err (!%p637_p4)
}
  0x2b   :  { %s641_s23 = scalar_lea.vmem %s41_s6, 2176  ;;  %p646_p6 = scmp.lt.s32.totalorder %s41_s6, %s41_s6 }
  0x2c   :  { %p642_p5 = scmp.ne.s32.totalorder %s41_s6, %s641_s23  ;;  %p647_p7 = scmp.lt.s32.totalorder %s641_s23, %s641_s23 }
  0x2e   :  { %p648_p8 = por %p647_p7, %p646_p6 }
  0x30   :  { %p649_p9 = pnand %p648_p8, %p642_p5 }
  0x32   :  { %652 = shalt.err (!%p649_p9)
}
  0x33   :  { %46 = dma.hbm_to_vmem [thread:$0]  %s832_s2, 2176, %s41_s6, [#allocation6], %s706_s25, %s706_s25, %s707_s26  }
  0x34   :  { %s710_s27 = smov [#allocation8]   ;;  %s653_s5 = scalar_lea.hbm %s833_s3, 2176 }
  0x35   :  { %s52_s28 = sshll.u32 %s710_s27, 4  ;;  %p654_p10 = scmp.ne.s32.totalorder %s833_s3, %s653_s5  ;;  %s53_s28 = int_to_ptr.vmem [resolvable:$true] %s52_s28 }
  0x36   :  { %p657_p11 = scmp.lt.u32.totalorder %s653_s5, %s833_s3 }
  0x38   :  { %p659_p12 = pnand %p657_p11, %p654_p10 }
  0x3a   :  { %662 = shalt.err (!%p659_p12)
}
  0x3b   :  { %s663_s11 = scalar_lea.vmem %s53_s28, 2176  ;;  %p668_p0 = scmp.lt.s32.totalorder %s53_s28, %s53_s28 }
  0x3c   :  { %p664_p13 = scmp.ne.s32.totalorder %s53_s28, %s663_s11  ;;  %p669_p1 = scmp.lt.s32.totalorder %s663_s11, %s663_s11 }
  0x3e   :  { %p670_p2 = por %p669_p1, %p668_p0 }
  0x40   :  { %p671_p3 = pnand %p670_p2, %p664_p13 }
  0x42   :  { %674 = shalt.err (!%p671_p3)
}
  0x43   :  { %58 = dma.hbm_to_vmem [thread:$0]  %s833_s3, 2176, %s53_s28, [#allocation9], %s706_s25, %s706_s25, %s707_s26  }
  0x44   :  { %697 = dma.done.wait [#allocation3], 128  }
  0x45   :  { %698 = vsyncadd [#allocation3], 4294967168 }
  0x46   :  { %699 = dma.done.wait [#allocation6], 2944  }
  0x47   :  { %700 = vsyncadd [#allocation6], 4294964352 }
  0x48   :  { %701 = dma.done.wait [#allocation9], 2176  }
  0x49   :  { %702 = vsyncadd [#allocation9], 4294965120  ;;  %v711_v0 = vmov 0.0|0.0   ;;  %vm712_vm0 = vmmov 0   ;;  %v713_v1 = vmov 0.0   ;;  %v72_v2 = vld [vmem:[#allocation5] sm:$0xff] }
  0x4a   :  { %515 = vmatprep.subr.bf16.mxu0 %v711_v0  ;;  %442 = vmatprep.mubr.msk.f32.mxu0 %vm712_vm0, %v713_v1  ;;  %v73_v3 = vld [vmem:[#allocation5 + $0x8] sm:$0xff]  ;;  %v74_v4 = vld [vmem:[#allocation5 + $0x10] sm:$0xff]  ;;  %v75_v6 = vld [vmem:[#allocation5 + $0x18] sm:$0xff]  ;;  %vm82_vm1 = vcmask 326656   ;;  %s714_s3 = smov [#allocation10]  }
  0x4b   :  { %521 = vmatprep.subr.bf16.mxu1 %v711_v0  ;;  %477 = vmatprep.mubr.msk.f32.mxu1 %vm712_vm0, %v713_v1  ;;  %v516_v5 = vpack.c.bf16 %v73_v3, %v72_v2  ;;  %v157_v7 = vld [vmem:[#allocation7] sm:$0xff]  ;;  %v158_v8 = vld [vmem:[#allocation7 + $0x8] sm:$0xff]  ;;  %v159_v9 = vld [vmem:[#allocation7 + $0x10] sm:$0xff]  ;;  %v519_v10 = vpack.c.bf16 %v75_v6, %v74_v4  ;;  %v364_v3 = vlaneseq  ;;  %s377_s25 = sshll.u32 %s714_s3, 4  ;;  %s378_s25 = int_to_ptr.vmem [resolvable:$true] %s377_s25 }
  0x4c   :  { %v522_v11 = vpack.c.bf16 %v158_v8, %v157_v7  ;;  %v160_v12 = vld [vmem:[#allocation7 + $0x18] sm:$0xff]  ;;  %v161_v14 = vld [vmem:[#allocation7 + $0x20] sm:$0xff]  ;;  %v162_v15 = vld [vmem:[#allocation7 + $0x28] sm:$0xff]  ;;  %s675_s26 = scalar_lea.vmem %s378_s25, 256  ;;  %p680_p5 = scmp.lt.s32.totalorder %s378_s25, %s378_s25 }
  0x4d   :  { %517 = vmatpush3.bf16.msra.mxu0 %v516_v5  ;;  %v525_v13 = vpack.c.bf16 %v160_v12, %v159_v9  ;;  %v76_v16 = vld [vmem:[#allocation5 + $0x20] sm:$0xff]  ;;  %v71_v17 = vld [vmem:[#allocation2] sm:$0xff]  ;;  %v528_v18 = vpack.c.bf16 %v162_v15, %v161_v14  ;;  %v164_v20 = vld [vmem:[#allocation7 + $0x38] sm:$0xff]  ;;  %v365_v6 = vand.u32 127, %v364_v3  ;;  %p676_p4 = scmp.ne.s32.totalorder %s378_s25, %s675_s26  ;;  %p681_p6 = scmp.lt.s32.totalorder %s675_s26, %s675_s26 }
  0x4e   :  { %518 = vmatprep.subr.bf16.mxu0 %v711_v0  ;;  %523 = vmatpush3.bf16.msra.mxu1 %v522_v11  ;;  %v163_v19 = vld [vmem:[#allocation7 + $0x30] sm:$0xff]  ;;  %v165_v22 = vld [vmem:[#allocation7 + $0x40] sm:$0xff]  ;;  %v166_v23 = vld [vmem:[#allocation7 + $0x48] sm:$0xff] }
  0x4f   :  { %524 = vmatprep.subr.bf16.mxu1 %v711_v0  ;;  %v531_v21 = vpack.c.bf16 %v164_v20, %v163_v19  ;;  %v534_v24 = vpack.c.bf16 %v166_v23, %v165_v22  ;;  %v167_v25 = vld [vmem:[#allocation7 + $0x50] sm:$0xff]  ;;  %v168_v26 = vld [vmem:[#allocation7 + $0x58] sm:$0xff]  ;;  %v169_v28 = vld [vmem:[#allocation7 + $0x60] sm:$0xff]  ;;  %vm366_vm3 = vcmp.ge.s32.totalorder %v365_v6, 96  ;;  %p682_p7 = por %p681_p6, %p680_p5 }
  0x50   :  { %v537_v27 = vpack.c.bf16 %v168_v26, %v167_v25  ;;  %v170_v29 = vld [vmem:[#allocation7 + $0x68] sm:$0xff]  ;;  %v171_v31 = vld [vmem:[#allocation7 + $0x70] sm:$0xff]  ;;  %v172_v32 = vld [vmem:[#allocation7 + $0x78] sm:$0xff] }
  0x51   :  { %520 = vmatpush3.bf16.msra.mxu0 %v519_v10  ;;  %v540_v30 = vpack.c.bf16 %v170_v29, %v169_v28  ;;  %v543_v33 = vpack.c.bf16 %v172_v32, %v171_v31  ;;  %v249_v34 = vld [vmem:[#allocation8] sm:$0xff]  ;;  %v250_v35 = vld [vmem:[#allocation8 + $0x8] sm:$0xff]  ;;  %v251_v36 = vld [vmem:[#allocation8 + $0x10] sm:$0xff]  ;;  %p683_p8 = pnand %p682_p7, %p676_p4 }
  0x52   :  { %440 = vmatprep.subr.mxu0 %v713_v1  ;;  %526 = vmatpush3.bf16.msra.mxu1 %v525_v13  ;;  %v546_v37 = vpack.c.bf16 %v250_v35, %v249_v34  ;;  %v252_v38 = vld [vmem:[#allocation8 + $0x18] sm:$0xff]  ;;  %v253_v40 = vld [vmem:[#allocation8 + $0x20] sm:$0xff]  ;;  %v254_v41 = vld [vmem:[#allocation8 + $0x28] sm:$0xff] }
  0x53   :  { %527 = vmatprep.subr.bf16.mxu1 %v711_v0  ;;  %v549_v39 = vpack.c.bf16 %v252_v38, %v251_v36  ;;  %v552_v42 = vpack.c.bf16 %v254_v41, %v253_v40  ;;  %v255_v43 = vld [vmem:[#allocation8 + $0x30] sm:$0xff]  ;;  %v256_v44 = vld [vmem:[#allocation8 + $0x38] sm:$0xff]  ;;  %v257_v46 = vld [vmem:[#allocation8 + $0x40] sm:$0xff] }
  0x54   :  { %v555_v45 = vpack.c.bf16 %v256_v44, %v255_v43  ;;  %v258_v47 = vld [vmem:[#allocation8 + $0x48] sm:$0xff]  ;;  %v259_v49 = vld [vmem:[#allocation8 + $0x50] sm:$0xff]  ;;  %v260_v50 = vld [vmem:[#allocation8 + $0x58] sm:$0xff] }
  0x55   :  { %441 = vmatpush3.msra.mxu0 %v76_v16  ;;  %v558_v48 = vpack.c.bf16 %v258_v47, %v257_v46  ;;  %v561_v51 = vpack.c.bf16 %v260_v50, %v259_v49  ;;  %v261_v52 = vld [vmem:[#allocation8 + $0x60] sm:$0xff]  ;;  %v262_v53 = vld [vmem:[#allocation8 + $0x68] sm:$0xff]  ;;  %v388_v55 = vld [vmem:[#allocation5 + $0x28] ss:$0 sm:$0xff] }
  0x56   :  { %443 = vmatmul.mubr.msk.f32.vlgmr.msra.gmra.mrb[0].mxu0 %vm82_vm1, %v71_v17  ;;  %545 = vmatprep.subr.bf16.mxu0 %v711_v0  ;;  %v564_v54 = vpack.c.bf16 %v262_v53, %v261_v52  ;;  %v263_v12 = vld [vmem:[#allocation8 + $0x70] sm:$0xff]  ;;  %v264_v13 = vld [vmem:[#allocation8 + $0x78] sm:$0xff]  ;;  %v391_v20 = vld [vmem:[#allocation8 + $0x80] ss:$0 sm:$0xff] }
  0x57   :  { %529 = vmatpush3.bf16.msra.mxu1 %v528_v18  ;;  %512 = vmatprep.mubr.msk.f32.mxu0 %vm712_vm0, %v713_v1  ;;  %v567_v14 = vpack.c.bf16 %v264_v13, %v263_v12  ;;  %v390_v15 = vld [vmem:[#allocation7 + $0x80] ss:$0 sm:$0xff] }
  0x58   :  { %530 = vmatprep.subr.bf16.mxu1 %v711_v0  ;;  %547 = vmatpush3.bf16.msra.mxu0 %v546_v37 }
  0x59   :  { %548 = vmatprep.subr.bf16.mxu0 %v711_v0 }
  0x5b   :  { %532 = vmatpush3.bf16.msra.mxu1 %v531_v21 }
  0x5c   :  { %533 = vmatprep.subr.bf16.mxu1 %v711_v0  ;;  %550 = vmatpush3.bf16.msra.mxu0 %v549_v39 }
  0x5d   :  { %551 = vmatprep.subr.bf16.mxu0 %v711_v0 }
  0x5f   :  { %535 = vmatpush3.bf16.msra.mxu1 %v534_v24 }
  0x60   :  { %536 = vmatprep.subr.bf16.mxu1 %v711_v0  ;;  %553 = vmatpush3.bf16.msra.mxu0 %v552_v42 }
  0x61   :  { %554 = vmatprep.subr.bf16.mxu0 %v711_v0 }
  0x63   :  { %538 = vmatpush3.bf16.msra.mxu1 %v537_v27 }
  0x64   :  { %539 = vmatprep.subr.bf16.mxu1 %v711_v0  ;;  %556 = vmatpush3.bf16.msra.mxu0 %v555_v45 }
  0x65   :  { %557 = vmatprep.subr.bf16.mxu0 %v711_v0 }
  0x67   :  { %541 = vmatpush3.bf16.msra.mxu1 %v540_v30 }
  0x68   :  { %542 = vmatprep.subr.bf16.mxu1 %v711_v0  ;;  %559 = vmatpush3.bf16.msra.mxu0 %v558_v48 }
  0x69   :  { %560 = vmatprep.subr.bf16.mxu0 %v711_v0 }
  0x6b   :  { %544 = vmatpush3.bf16.msra.mxu1 %v543_v33 }
  0x6c   :  { %562 = vmatpush3.bf16.msra.mxu0 %v561_v51 }
  0x6d   :  { %563 = vmatprep.subr.bf16.mxu0 %v711_v0 }
  0x70   :  { %565 = vmatpush3.bf16.msra.mxu0 %v564_v54 }
  0x71   :  { %566 = vmatprep.subr.bf16.mxu0 %v711_v0 }
  0x74   :  { %568 = vmatpush3.bf16.msra.mxu0 %v567_v14 }
 0x129   :  { %v152_v56 = vpop.f32.mrb[0].mxu0 }
 0x12a   :  { %v153_v57 = vadd.f32 %v388_v55, %v152_v56  ;;  %v444_v58 = vpop.f32.mrb[1].mxu0 }
 0x12c   :  { %v156_v59 = vmax.f32 %v153_v57, 0.0  ;;  %v350_v60 = vand.u32 2147483647, %v153_v57 }
 0x12e   :  { %v351_v61 = vsub.f32 0.0, %v350_v60  ;;  %478 = vmatmul.mubr.f32.vlgmr.msra.gmra.mrb[0].mxu1 %v156_v59 }
 0x130   :  { %v352_v62 = vmul.f32 1.442695, %v351_v61 }
 0x132   :  { %579 = vpow2.f32 %v352_v62 }
 0x13c   :  { %v580_v63 = vpop.eup %579 }
 0x13d   :  { %v354_v1 = vadd.f32 1.0, %v580_v63  ;;  %v357_v2 = vmul.f32 -0.5, %v580_v63  ;;  %v360_v5 = vand.u32 2147483647, %v580_v63 }
 0x13f   :  { %581 = vlog2.f32 %v354_v1  ;;  %v358_v4 = vadd.f32 1.0, %v357_v2  ;;  %vm361_vm2 = vcmp.lt.f32.partialorder %v360_v5, 0.0004427343 }
 0x141   :  { %v359_v8 = vmul.f32 %v580_v63, %v358_v4 }
 0x149   :  { %v582_v7 = vpop.eup %581 }
 0x14a   :  { %v356_v0 = vmul.f32 0.6931472, %v582_v7 }
 0x14c   :  { %v362_v9 = vsel %vm361_vm2, %v359_v8, %v356_v0 }
 0x14d   :  { %v363_v10 = vadd.f32 %v362_v9, %v156_v59 }
 0x14f   :  { %v369_v11 = vsel %vm366_vm3, %v363_v10, %v156_v59 }
 0x150   :  { %370 = vst [vmem:[#allocation10 + $0x8] sm:$0xff] %v369_v11 }
 0x201   :  { %v244_v16 = vpop.f32.mrb[0].mxu1 }
 0x202   :  { %v245_v17 = vadd.f32 %v390_v15, %v244_v16  ;;  %v479_v18 = vpop.f32.mrb[1].mxu1 }
 0x204   :  { %v248_v19 = vmax.f32 %v245_v17, 0.0 }
 0x206   :  { %513 = vmatmul.mubr.f32.vlgmr.msra.gmra.mrb[2].mxu0 %v248_v19 }
 0x2d9   :  { %v336_v21 = vpop.f32.mrb[2].mxu0 }
 0x2da   :  { %v337_v22 = vadd.f32 %v391_v20, %v336_v21  ;;  %v514_v23 = vpop.f32.mrb[3].mxu0 }
 0x2dc   :  { %340 = vmax.xlane.f32.xlu0 %v337_v22 }
 0x369   :  { %v341_v24 = vpop.xlane.xlu0 %340 }
 0x36a   :  { %v342_v25 = vsub.f32 %v337_v22, %v341_v24 }
 0x36c   :  { %v343_v26 = vmul.f32 1.442695, %v342_v25 }
 0x36e   :  { %583 = vpow2.f32 %v343_v26 }
 0x378   :  { %v584_v27 = vpop.eup %583 }
 0x379   :  { %345 = vadd.xlane.f32.xlu0 %v584_v27 }
 0x406   :  { %v346_v28 = vpop.xlane.xlu0 %345 }
 0x407   :  { %585 = vrcp.f32 %v346_v28 }
 0x411   :  { %v586_v29 = vpop.eup %585 }
 0x412   :  { %v348_v30 = vmul.f32 %v586_v29, %v584_v27 }
 0x414   :  { %349 = vst [vmem:[#allocation10] sm:$0xff] %v348_v30 }
 0x415   :  { %686 = shalt.err (!%p683_p8)
}
 0x416   :  { %s687_s1 = scalar_lea.hbm %s834_s4, 256 }
 0x417   :  { %p688_p9 = scmp.ne.s32.totalorder %s834_s4, %s687_s1  ;;  %p691_p10 = scmp.lt.u32.totalorder %s687_s1, %s834_s4 }
 0x419   :  { %p693_p11 = pnand %p691_p10, %p688_p9 }
 0x41b   :  { %696 = shalt.err (!%p693_p11)
}
 0x41c   :  { %380 = dma.vmem_to_hbm [thread:$0]  %s378_s25, 256, %s834_s4, [#allocation4]  }
 0x41d   :  { %703 = dma.done.wait [#allocation4], 256  }
 0x41e   :  { %704 = vsyncadd [#allocation4], 4294967040 }
 0x41f   :  { %384 = vsyncpa [#allocation3], 1 }
 0x420   :  { %385 = vsyncpa [#allocation6], 1 }
 0x421   :  { %386 = vsyncpa [#allocation9], 1 }
 0x422   :  { %387 = vsyncpa [#allocation4], 1 }

</bundles_post_ra>
